<compile_context>
chip_gen: v5e
topology: v5e:2x2
jax: 0.10.0
libtpu: 0.0.40
codegen_flags: <defaults>
</compile_context>

<pallas_src>
import functools

import jax
import jax.numpy as jnp
from jax import lax
from jax.experimental import pallas as pl
from jax.experimental.pallas import tpu as pltpu


def _round_up(x, m):
    return (x + m - 1) // m * m


def _lm_head_kernel(eps, x_ref, g_ref, b_ref, w_ref, o_ref, y_ref):
    # x_ref:  (tm, H)      hidden-state row tile (input dtype), revisited across j
    # g_ref:  (1, H)       layernorm gamma
    # b_ref:  (1, H)       layernorm beta
    # w_ref:  (tile_v, H)  lm_head weight tile, native [V, H] layout, bf16
    # o_ref:  (tm, tile_v) output logits tile
    # y_ref:  (tm, H)      VMEM scratch: normalized rows (bf16), computed once
    #                      per row tile (j == 0) and reused for every vocab tile.

    @pl.when(pl.program_id(1) == 0)
    def _compute_layernorm():
        x = x_ref[...].astype(jnp.float32)
        mean = jnp.mean(x, axis=-1, keepdims=True)
        centered = x - mean
        # biased variance, matching torch.nn.LayerNorm
        var = jnp.mean(centered * centered, axis=-1, keepdims=True)
        xn = centered * lax.rsqrt(var + eps)
        y = xn * g_ref[...].astype(jnp.float32) + b_ref[...].astype(jnp.float32)
        y_ref[...] = y.astype(y_ref.dtype)

    # Contract over H with the weight in its native [V, H] layout:
    # (tm, H) x (tile_v, H)^T -> (tm, tile_v), f32 accumulation on the MXU.
    o_ref[...] = lax.dot_general(
        y_ref[...],
        w_ref[...],
        dimension_numbers=(((1,), (1,)), ((), ())),
        preferred_element_type=jnp.float32,
    ).astype(o_ref.dtype)


def gpt_lm_head(
    hidden_states,
    gamma,
    beta,
    lm_head_weight,
    *,
    eps=1e-5,
    tm=256,
    tile_v=512,          # use 256 on v7x (64 MiB VMEM)
    compute_dtype=jnp.bfloat16,
):
    """hidden_states: [B, S, H]; lm_head_weight: [V, H] (PyTorch Linear layout)."""
    B, S, H = hidden_states.shape
    V, H_w = lm_head_weight.shape
    assert H == H_w, "weight hidden dim mismatch"
    M = B * S

    # --- pick row tile and pad rows (cheap: zeros in activations) ---
    tm = max(8, (min(tm, _round_up(M, 8)) // 8) * 8)
    M_pad = _round_up(M, tm)

    # --- pick vocab tile and pad vocab if ragged (only copies the weight when
    #     V is not already a multiple of tile_v; GLM-130B's 150528 divides 512). ---
    tile_v = max(128, (min(tile_v, _round_up(V, 128)) // 128) * 128)
    V_pad = _round_up(V, tile_v)

    x2d = hidden_states.reshape(M, H)
    if M_pad != M:
        x2d = jnp.pad(x2d, ((0, M_pad - M), (0, 0)))
    g2d = gamma.reshape(1, H)
    b2d = beta.reshape(1, H)
    # Single low-precision cast, NO transpose (MXU contracts over H natively).
    w_lp = lm_head_weight.astype(compute_dtype)
    if V_pad != V:
        w_lp = jnp.pad(w_lp, ((0, V_pad - V), (0, 0)))

    out_dtype = hidden_states.dtype
    x_bytes = jnp.dtype(x2d.dtype).itemsize
    o_bytes = jnp.dtype(out_dtype).itemsize
    cd_bytes = jnp.dtype(compute_dtype).itemsize
    # double-buffered x / w / out tiles + y scratch + gamma/beta + headroom
    vmem_need = (
        2 * tm * H * x_bytes
        + 2 * tile_v * H * cd_bytes
        + 2 * tm * tile_v * o_bytes
        + tm * H * cd_bytes
        + 4 * H * 4
    )
    vmem_limit = int(min(vmem_need * 1.5 + (4 << 20), 96 << 20))

    kernel = functools.partial(_lm_head_kernel, eps)

    out = pl.pallas_call(
        kernel,
        out_shape=jax.ShapeDtypeStruct((M_pad, V_pad), out_dtype),
        grid_spec=pltpu.PrefetchScalarGridSpec(
            num_scalar_prefetch=0,
            grid=(M_pad // tm, V_pad // tile_v),
            in_specs=[
                pl.BlockSpec((tm, H), lambda i, j: (i, 0)),       # x rows (revisited across j)
                pl.BlockSpec((1, H), lambda i, j: (0, 0)),        # gamma
                pl.BlockSpec((1, H), lambda i, j: (0, 0)),        # beta
                pl.BlockSpec((tile_v, H), lambda i, j: (j, 0)),   # weight tile, native [V, H]
            ],
            out_specs=pl.BlockSpec((tm, tile_v), lambda i, j: (i, j)),
            scratch_shapes=[pltpu.VMEM((tm, H), compute_dtype)],  # normalized rows
        ),
        compiler_params=pltpu.CompilerParams(
            # row axis parallel (megacore sharding); vocab axis carries the
            # y_ref scratch, so it must stay sequential.
            dimension_semantics=("parallel", "arbitrary"),
            vmem_limit_bytes=vmem_limit,
        ),
    )(x2d, g2d, b2d, w_lp)

    if M_pad != M or V_pad != V:
        out = out[:M, :V]
    return out.reshape(B, S, V)


def _reference(hidden_states, gamma, beta, lm_head_weight, eps, compute_dtype):
    # Mirrors the kernel's numerics: f32 LayerNorm, low-precision matmul
    # inputs, f32 accumulation.
    x = hidden_states.astype(jnp.float32)
    mean = jnp.mean(x, axis=-1, keepdims=True)
    var = jnp.mean((x - mean) ** 2, axis=-1, keepdims=True)
    y = (x - mean) * lax.rsqrt(var + eps) * gamma.astype(jnp.float32) + beta.astype(
        jnp.float32
    )
    y = y.astype(compute_dtype)
    w = lm_head_weight.astype(compute_dtype)
    out = jnp.einsum("bsh,vh->bsv", y, w, preferred_element_type=jnp.float32)
    return out.astype(hidden_states.dtype)


if __name__ == "__main__":
    eps = 1e-5
    key = jax.random.PRNGKey(0)

    # --- Case 1: small, config-consistent shapes (scaled from H=12288 / V=150528),
    #     tiles chosen so the (rows, vocab) grid is actually exercised: (2, 4). ---
    B, S, H, V = 2, 8, 128, 512
    k_x, k_g, k_b, k_w = jax.random.split(key, 4)
    hidden_states = jax.random.normal(k_x, (B, S, H), dtype=jnp.float32)
    gamma = 1.0 + 0.1 * jax.random.normal(k_g, (H,), dtype=jnp.float32)
    beta = 0.1 * jax.random.normal(k_b, (H,), dtype=jnp.float32)
    lm_head_weight = 0.02 * jax.random.normal(k_w, (V, H), dtype=jnp.float32)

    out = gpt_lm_head(
        hidden_states, gamma, beta, lm_head_weight, eps=eps, tm=8, tile_v=128
    )
    out = jax.block_until_ready(out)
    ref = _reference(hidden_states, gamma, beta, lm_head_weight, eps, jnp.bfloat16)
    assert out.shape == (B, S, V)
    assert jnp.allclose(out, ref, atol=2e-2, rtol=2e-2), "mismatch vs reference (case 1)"

    # --- Case 2: ragged rows and vocab to exercise the padding path. ---
    B2, S2, H2, V2 = 2, 7, 128, 320
    k_x2, k_w2 = jax.random.split(k_w, 2)
    hs2 = jax.random.normal(k_x2, (B2, S2, H2), dtype=jnp.float32)
    w2 = 0.02 * jax.random.normal(k_w2, (V2, H2), dtype=jnp.float32)
    out2 = gpt_lm_head(hs2, gamma, beta, w2, eps=eps, tm=8, tile_v=128)
    out2 = jax.block_until_ready(out2)
    ref2 = _reference(hs2, gamma, beta, w2, eps, jnp.bfloat16)
    assert out2.shape == (B2, S2, V2)
    assert jnp.allclose(out2, ref2, atol=2e-2, rtol=2e-2), "mismatch vs reference (case 2)"

    print("KERNEL_OK")
</pallas_src>

<mosaic_0001>
module attributes {stable_mosaic.version = 11 : i64} {
  func.func @_lm_head_kernel(%arg0: i32, %arg1: i32, %arg2: memref<8x128xf32, #tpu.memory_space<vmem>>, %arg3: memref<1x128xf32, #tpu.memory_space<vmem>>, %arg4: memref<1x128xf32, #tpu.memory_space<vmem>>, %arg5: memref<128x128xbf16, #tpu.memory_space<vmem>>, %arg6: memref<8x128xf32, #tpu.memory_space<vmem>>, %arg7: memref<8x128xbf16, #tpu.memory_space<vmem>>) attributes {dimension_semantics = [#tpu.dimension_semantics<parallel>, #tpu.dimension_semantics<arbitrary>], iteration_bounds = array<i64: 2, 4>, scalar_prefetch = 0 : i64, scratch_operands = 1 : i64, tpu.core_type = #tpu.core_type<tc>, window_params = [{transform_indices = @transform_0, window_bounds = array<i64: 8, 128>}, {pipeline_mode = #tpu.pipeline_mode<synchronous>, transform_indices = @transform_1, window_bounds = array<i64: 1, 128>}, {pipeline_mode = #tpu.pipeline_mode<synchronous>, transform_indices = @transform_2, window_bounds = array<i64: 1, 128>}, {transform_indices = @transform_3, window_bounds = array<i64: 128, 128>}, {transform_indices = @transform_4, window_bounds = array<i64: 8, 128>}]} {
    %c0_i32 = arith.constant 0 : i32
    %0 = arith.cmpi eq, %arg1, %c0_i32 : i32
    %1 = arith.extui %0 : i1 to i32
    %c0_i32_0 = arith.constant 0 : i32
    %2 = arith.cmpi ne, %1, %c0_i32_0 : i32
    scf.if %2 {
      %c0_6 = arith.constant 0 : index
      %c0_7 = arith.constant 0 : index
      %7 = vector.load %arg2[%c0_6, %c0_7] : memref<8x128xf32, #tpu.memory_space<vmem>>, vector<8x128xf32>
      %cst_8 = arith.constant dense<0.000000e+00> : vector<8xf32>
      %8 = vector.multi_reduction <add>, %7, %cst_8 [1] : vector<8x128xf32> to vector<8xf32>
      %9 = vector.shape_cast %8 : vector<8xf32> to vector<8x1xf32>
      %cst_9 = arith.constant 1.280000e+02 : f32
      %10 = vector.broadcast %cst_9 : f32 to vector<8x1xf32>
      %11 = arith.divf %9, %10 : vector<8x1xf32>
      %12 = vector.broadcast %11 : vector<8x1xf32> to vector<8x128xf32>
      %13 = arith.subf %7, %12 : vector<8x128xf32>
      %14 = arith.mulf %13, %13 : vector<8x128xf32>
      %cst_10 = arith.constant dense<0.000000e+00> : vector<8xf32>
      %15 = vector.multi_reduction <add>, %14, %cst_10 [1] : vector<8x128xf32> to vector<8xf32>
      %16 = vector.shape_cast %15 : vector<8xf32> to vector<8x1xf32>
      %cst_11 = arith.constant 1.280000e+02 : f32
      %17 = vector.broadcast %cst_11 : f32 to vector<8x1xf32>
      %18 = arith.divf %16, %17 : vector<8x1xf32>
      %cst_12 = arith.constant 9.99999974E-6 : f32
      %19 = vector.broadcast %cst_12 : f32 to vector<8x1xf32>
      %20 = arith.addf %18, %19 : vector<8x1xf32>
      %21 = math.rsqrt %20 : vector<8x1xf32>
      %22 = vector.broadcast %21 : vector<8x1xf32> to vector<8x128xf32>
      %23 = arith.mulf %13, %22 : vector<8x128xf32>
      %c0_13 = arith.constant 0 : index
      %c0_14 = arith.constant 0 : index
      %24 = vector.load %arg3[%c0_13, %c0_14] : memref<1x128xf32, #tpu.memory_space<vmem>>, vector<1x128xf32>
      %25 = vector.broadcast %24 : vector<1x128xf32> to vector<8x128xf32>
      %26 = arith.mulf %23, %25 : vector<8x128xf32>
      %c0_15 = arith.constant 0 : index
      %c0_16 = arith.constant 0 : index
      %27 = vector.load %arg4[%c0_15, %c0_16] : memref<1x128xf32, #tpu.memory_space<vmem>>, vector<1x128xf32>
      %28 = vector.broadcast %27 : vector<1x128xf32> to vector<8x128xf32>
      %29 = arith.addf %26, %28 : vector<8x128xf32>
      %30 = arith.truncf %29 : vector<8x128xf32> to vector<8x128xbf16>
      %c0_17 = arith.constant 0 : index
      %c0_18 = arith.constant 0 : index
      %31 = vector.load %arg7[%c0_17, %c0_18] : memref<8x128xbf16, #tpu.memory_space<vmem>>, vector<8x128xbf16>
      tpu.vector_store %arg7[%c0_17, %c0_18], %30 {strides = array<i32>} : memref<8x128xbf16, #tpu.memory_space<vmem>>, vector<8x128xbf16>,
    } else {
    }
    %c0 = arith.constant 0 : index
    %c0_1 = arith.constant 0 : index
    %3 = vector.load %arg7[%c0, %c0_1] : memref<8x128xbf16, #tpu.memory_space<vmem>>, vector<8x128xbf16>
    %c0_2 = arith.constant 0 : index
    %c0_3 = arith.constant 0 : index
    %4 = vector.load %arg5[%c0_2, %c0_3] : memref<128x128xbf16, #tpu.memory_space<vmem>>, vector<128x128xbf16>
    %cst = arith.constant dense<0.000000e+00> : vector<8x128xf32>
    %5 = tpu.matmul %3, %4, %cst {dimension_numbers = #tpu.dot_dimension_numbers<[1], [1], [0], [0], [0, 0, 1, 0], [], []>} : vector<8x128xbf16>, vector<128x128xbf16>, vector<8x128xf32> -> vector<8x128xf32>
    %c0_4 = arith.constant 0 : index
    %c0_5 = arith.constant 0 : index
    %6 = vector.load %arg6[%c0_4, %c0_5] : memref<8x128xf32, #tpu.memory_space<vmem>>, vector<8x128xf32>
    tpu.vector_store %arg6[%c0_4, %c0_5], %5 {strides = array<i32>} : memref<8x128xf32, #tpu.memory_space<vmem>>, vector<8x128xf32>,
    return
  }
  func.func @transform_0(%arg0: i32, %arg1: i32) -> (i32, i32) {
    %c0_i32 = arith.constant 0 : i32
    %c0_i32_0 = arith.constant 0 : i32
    return %arg0, %c0_i32 : i32, i32
  }
  func.func @transform_1(%arg0: i32, %arg1: i32) -> (i32, i32) {
    %c0_i32 = arith.constant 0 : i32
    %c0_i32_0 = arith.constant 0 : i32
    %c0_i32_1 = arith.constant 0 : i32
    return %c0_i32, %c0_i32_0 : i32, i32
  }
  func.func @transform_2(%arg0: i32, %arg1: i32) -> (i32, i32) {
    %c0_i32 = arith.constant 0 : i32
    %c0_i32_0 = arith.constant 0 : i32
    %c0_i32_1 = arith.constant 0 : i32
    return %c0_i32, %c0_i32_0 : i32, i32
  }
  func.func @transform_3(%arg0: i32, %arg1: i32) -> (i32, i32) {
    %c0_i32 = arith.constant 0 : i32
    %c0_i32_0 = arith.constant 0 : i32
    return %arg1, %c0_i32 : i32, i32
  }
  func.func @transform_4(%arg0: i32, %arg1: i32) -> (i32, i32) {
    %c0_i32 = arith.constant 0 : i32
    return %arg0, %arg1 : i32, i32
  }
}

</mosaic_0001>

<bundles_post_ra>
// kernel: tpu_custom_call.1
= control target key start
LH: loop header
LB: loop body
LE: loop exit
PB: predicated region body
PF: predicated region fallthrough
CT: control target
= control target key end

     0   :  { %s1322_s0 = inlined_call_operand.hbm [shape: f32[16,128], index: 0, kind: input, shape index: {}]   ;;  %s1323_s1 = inlined_call_operand.hbm [shape: f32[1,128], index: 1, kind: input, shape index: {}]   ;;  %s1324_s2 = inlined_call_operand.vmem [shape: f32[1,128], index: 2, kind: input, shape index: {}]   ;;  %s1325_s3 = inlined_call_operand.hbm [shape: bf16[512,128], index: 3, kind: input, shape index: {}]   ;;  %s1326_s4 = inlined_call_operand.hbm [shape: f32[16,512], index: 4, kind: output, shape index: {}]  }
   0x1   :  { %1335 = sst [smem:[#allocation24_spill]] %s1322_s0 }
   0x2   :  { %1336 = sst [smem:[#allocation25_spill]] %s1323_s1 }
   0x3   :  { %1337 = sst [smem:[#allocation26_spill]] %s1326_s4 }
   0x4   :  { %9 = vsyncpa [#allocation4], 0 }
   0x5   :  { %11 = vsyncpa [#allocation4 + $0x1], 0 }
   0x6   :  { %12 = vsyncpa [#allocation7], 0 }
   0x7   :  { %13 = vsyncpa [#allocation5], 0 }
   0x8   :  { %15 = vsyncpa [#allocation5 + $0x1], 0  ;;  %s1026_s15 = smov 0   ;;  %s1028_s16 = smov 0  }
   0x9   :  { %s1030_s17 = smov 0   ;;  %s1032_s18 = smov 0  }
   0xa   :  { %s1034_s19 = smov 0   ;;  %s1036_s20 = smov 0  }
   0xb   :  { %s1038_s21 = smov 0   ;;  %s1040_s22 = smov 0  }
   0xc   :  { %s1042_s23 = smov 0   ;;  %s1044_s24 = smov 0  }
   0xd   :  { %s1046_s25 = smov 0   ;;  %s1048_s26 = smov 0  }
   0xe   :  { %s1050_s27 = smov 0   ;;  %s1052_s28 = smov 0  }
   0xf LB: > { %1338 = sst [smem:[#allocation14_spill]] %s951_s17  ;;  %s30_s29 = sadd.s32 1, %s987_s26  ;;  %s995_s28 = sphi %s1052_s28, %s21_s28   ;;  %s991_s27 = sphi %s1050_s27, %s1369_s27   ;;  %s987_s26 = sphi %s1048_s26, %s1377_s26   ;;  %s983_s25 = sphi %s1046_s25, %s1367_s25   ;;  %s979_s24 = sphi %s1044_s24, %s1376_s24   ;;  %s975_s23 = sphi %s1042_s23, %s1366_s23   ;;  %s971_s22 = sphi %s1040_s22, %s1375_s22   ;;  %s967_s21 = sphi %s1038_s21, %s1374_s21   ;;  %s963_s20 = sphi %s1036_s20, %s1364_s20   ;;  %s959_s19 = sphi %s1034_s19, %s1373_s19   ;;  %s955_s18 = sphi %s1032_s18, %s1372_s18   ;;  %s951_s17 = sphi %s1030_s17, %s1362_s17   ;;  %s947_s16 = sphi %s1028_s16, %s1371_s16   ;;  %s943_s15 = sphi %s1026_s15, %s1370_s15  }
  0x10   : > { %1339 = sst [smem:[#allocation15_spill]] %s963_s20  ;;  %s33_s30 = sadd.s32 1, %s991_s27 }
  0x11   : > { %1340 = sst [smem:[#allocation16_spill]] %s975_s23  ;;  %p31_p0 = scmp.ge.s32.totalorder %s30_s29, 4 }
  0x12   : > { %1341 = sst [smem:[#allocation17_spill]] %s991_s27  ;;  %s40_s5 = sadd.s32 1, %s975_s23 }
  0x13   : > { %p47_p1 = scmp.ne.s32.totalorder %s975_s23, %s971_s22  ;;  %p48_p2 = scmp.eq.s32.totalorder %s995_s28, 0 }
  0x14   : > { %s1379_s29 = smov (%p31_p0, %s30_s29), 0  ;;  %s1381_s30 = smov (!%p31_p0, %s33_s30), %s991_s27 }
  0x15   : > { %1342 = sst [smem:[#allocation18_spill]] %s1379_s29  ;;  %p1107_p3 = por %p48_p2, %p47_p1 }
  0x16   : > { %p53_p4 = scmp.ne.s32.totalorder %s971_s22, %s967_s21  ;;  %p35_p5 = scmp.ge.s32.totalorder %s1381_s30, 2 }
  0x17   : > { %s105_s7 = ssub.s32 %s987_s26, %s1379_s29  ;;  %s108_s8 = sadd.s32 1, %s963_s20 }
  0x18   : > { %p106_p6 = scmp.eq.s32.totalorder %s105_s7, 0  ;;  %s1383_s30 = smov (%p35_p5, %s1381_s30), 0 }
  0x19   : > { %1344 = sst [smem:[#allocation19_spill]] %s1383_s30  ;;  %s37_s10 = ssub.s32 %s991_s27, %s1383_s30 }
  0x1a   : > { %s1119_s9 = scalar_select %p106_p6, %s963_s20, %s108_s8  }
  0x1b   : > { %p115_p7 = scmp.ne.s32.totalorder %s963_s20, %s959_s19  ;;  %p38_p8 = scmp.eq.s32.totalorder %s37_s10, 0 }
  0x1c   : > { %1345 = sst [smem:[#allocation20_spill]] %s1119_s9  ;;  %s133_s11 = sor.u32 %s105_s7, %s37_s10 }
  0x1d   : > { %p1127_p9 = por %p115_p7, %p48_p2  ;;  %p134_p10 = scmp.eq.s32.totalorder %s133_s11, 0 }
  0x1e   : > { %s1132_s13 = scalar_select %p38_p8, %s975_s23, %s40_s5  }
  0x1f   : > { %s136_s14 = sadd.s32 1, %s951_s17  ;;  %p626_p11 = scmp.lt.s32.totalorder %s995_s28, 8 }
  0x20   : > { %1347 = sst [smem:[#allocation21_spill]] %s1132_s13  ;;  %s188_s8 = sand.u32 1, %s995_s28  }
  0x21   : > { %s1136_s29 = scalar_select %p134_p10, %s951_s17, %s136_s14  }
  0x22   : > { %s190_s30 = sand.u32 1, %s975_s23   ;;  %s544_s10 = sshll.u32 %s991_s27, 3 }
  0x23   : > { %1348 = sst [smem:[#allocation22_spill]] %s1136_s29  ;;  %s543_s7 = sshll.u32 %s190_s30, 3 }
  0x24   : > { %s1349_s0 = sld [smem:[#allocation24_spill]]  ;;  %s192_s14 = scalar_lea.vmem [#allocation3], %s543_s7 }
  0x25   : > { %s200_s13 = sshll.u32 %s192_s14, 4  ;;  %p615_p12 = pnand %p626_p11, %p1107_p3  ;;  %s201_s13 = int_to_ptr.vmem [resolvable:$true] %s200_s13 }
  0x26   : > { %p1149_p13 = pnand %p626_p11, %p1127_p9  ;;  %s1153_s4 = scalar_lea.sflag [#allocation4], %s188_s8 }
  0x27   : > { %s1157_s9 = sadd.s32 4294967295, %s995_s28   ;;  %s539_s7 = sadd.s32 4294967294, %s995_s28  }
  0x28   : > { %p54_p0 = scmp.eq.s32.totalorder %s1157_s9, 0  ;;  %p121_p1 = scmp.ne.s32.totalorder %s959_s19, %s955_s18 }
  0x29   : > { %p146_p2 = scmp.ne.s32.totalorder %s951_s17, %s947_s16  ;;  %p147_p3 = scmp.eq.s32.totalorder %s1157_s9, 7 }
  0x2a   : > { %s196_s11 = scalar_lea.hbm %s1349_s0, %s544_s10  ;;  %p1171_p5 = por %p54_p0, %p53_p4 }
  0x2b   : > { %s198_s5 = sshll.u32 %s196_s11, 4  ;;  %p1177_p6 = por %p121_p1, %p54_p0  ;;  %s199_s5 = int_to_ptr.hbm [resolvable:$true] %s198_s5 }
  0x2c   : > { %617 = dma.hbm_to_vmem [thread:$0]  (!%p615_p12), %s199_s5, 128, %s201_s13, %s1153_s4  }
  0x2d   : > { %p1181_p7 = por %p147_p3, %p146_p2  ;;  %p152_p8 = scmp.ne.s32.totalorder %s947_s16, %s943_s15 }
  0x2e   : > { %p153_p9 = scmp.eq.s32.totalorder %s539_s7, 7  ;;  %p540_p10 = scmp.ge.s32.totalorder %s995_s28, 1 }
  0x2f   : > { %p160_p11 = scmp.lt.s32.totalorder %s995_s28, 9  ;;  %s1356_s1 = sld [smem:[#allocation25_spill]] }
  0x30   : > { %p1189_p12 = por %p153_p9, %p152_p8  ;;  %s209_s5 = sand.u32 1, %s963_s20  }
  0x31   : > { %p1196_p4 = pnand %p540_p10, %p160_p11  ;;  %s997_s14 = smov [#allocation6]  }
  0x32   : > { %s1354_s18 = scalar_select %p1189_p12, 1, 0 }
  0x33   : > { %p610_p1 = pneg %p1196_p4  ;;  %s174_s7 = sshll.u32 %s997_s14, 4  ;;  %s175_s7 = int_to_ptr.vmem [resolvable:$true] %s174_s7 }
  0x34   : > { %1355 = sst [smem:[#allocation23_spill]] %s1354_s18  ;;  %s545_s0 = sshll.u32 %s209_s5, 6 }
  0x35   : > { %s172_s10 = sshll.u32 %s1356_s1, 4  ;;  %p611_p2 = pnand %p610_p1, %p54_p0  ;;  %s173_s10 = int_to_ptr.hbm [resolvable:$true] %s172_s10 }
  0x36   : > { %s591_s27 = sshll.u32 %s987_s26, 6  ;;  %s211_s21 = scalar_lea.vmem [#allocation8], %s545_s0 }
  0x37   : > { %s219_s8 = sshll.u32 %s211_s21, 4  ;;  %s216_s29 = scalar_lea.hbm %s1325_s3, %s591_s27  ;;  %s220_s8 = int_to_ptr.vmem [resolvable:$true] %s219_s8 }
  0x38   : > { %613 = dma.hbm_to_vmem [thread:$0]  (!%p611_p2), %s173_s10, 16, %s175_s7, [#allocation7]  }
  0x39   : > { %s217_s17 = sshll.u32 %s216_s29, 4  ;;  %s998_s20 = smov 64   ;;  %s218_s17 = int_to_ptr.hbm [resolvable:$true] %s217_s17 }
  0x3a   : > { %s999_s18 = smov 4   ;;  %231 = sbr.rel (%p1196_p4) target bundleno = 545 (0x221), region = 36 }
  0x3b   : > { %620 = dma.hbm_to_vmem [thread:$0]  (!%p1149_p13), %s218_s17, 1024, %s220_s8, %s1153_s4, %s998_s20, %s998_s20, %s999_s18  }
  0x3c   : > { %s233_s0 = sand.u32 (!%p1196_p4), 1, %s1157_s9   ;;  %s235_s5 = sand.u32 (!%p1196_p4), 1, %s971_s22  }
  0x3d   : > { %s549_s14 = sshll.u32 (!%p1196_p4), %s235_s5, 3  ;;  %s234_s21 = scalar_lea.sflag (!%p1196_p4), [#allocation4], %s233_s0 }
  0x3e   : > { %s237_s1 = scalar_lea.vmem (!%p1196_p4), [#allocation3], %s549_s14 }
  0x3f   : > { %926 = dma.done.wait (%p1171_p5), %s234_s21, 128  }
  0x40   : > { %928 = vsyncadd (%p1171_p5), %s234_s21, 4294967168 }
  0x41   : > { %930 = dma.done.wait (%p54_p0), [#allocation7], 16  }
  0x42   : > { %932 = vsyncadd (%p54_p0), [#allocation7], 4294967280  ;;  %s250_s17 = sand.u32 1, %s959_s19  }
  0x43   : > { %s551_s20 = sshll.u32 %s250_s17, 6 }
  0x44   : > { %s1225_s23 = scalar_lea.vmem [#allocation8], %s551_s20 }
  0x45   : > { %934 = dma.done.wait (%p1177_p6), %s234_s21, 1024  }
  0x46   : > { %936 = vsyncadd (%p1177_p6), %s234_s21, 4294966272  ;;  %s280_s27 = sand.u32 1, %s947_s16   ;;  %p553_p13 = scmp.ne.s32.totalorder %s979_s24, 0 }
  0x47   : > { %s1234_s29 = sshll.u32 %s280_s27, 3 }
  0x48   : > { %s282_s30 = scalar_lea.vmem [#allocation9], %s1234_s29  ;;  %287 = sbr.rel (%p553_p13) target bundleno = 347 (0x15b), region = 52 }
  0x4d   : > { %v288_v0 = vld [vmem:[%s237_s1] sm:$0xff]  ;;  %v1000_v1 = vmov 128.0   ;;  %v745_v21 = vld [vmem:[#allocation6] ss:$0 sm:$0xff]  ;;  %v746_v23 = vld [vmem:[%s1324_s2] ss:$0 sm:$0xff] }
  0x4e   : > { %289 = vadd.xlane.f32.xlu0 %v288_v0  ;;  %747 = vrcp.f32 %v1000_v1 }
  0x54   : > { %v748_v2 = vpop.eup %747 }
  0x55   : > { %v292_v3 = vmul.f32 128.0, %v748_v2  ;;  %vm296_vm0 = vweird.f32 %v748_v2 }
  0x57   : > { %v293_v4 = vsub.f32 1.0, %v292_v3 }
  0x59   : > { %v294_v5 = vmul.f32 %v748_v2, %v293_v4 }
  0x5b   : > { %v295_v6 = vadd.f32 %v748_v2, %v294_v5 }
  0x5d   : > { %v297_v7 = vsel %vm296_vm0, %v748_v2, %v295_v6 }
  0xc1   : > { %v290_v8 = vpop.xlane.xlu0 %289 }
  0xc2   : > { %v298_v9 = vmul.f32 %v297_v7, %v290_v8 }
  0xc4   : > { %v299_v10 = vsub.f32 %v288_v0, %v298_v9 }
  0xc6   : > { %v300_v11 = vmul.f32 %v299_v10, %v299_v10 }
  0xc8   : > { %301 = vadd.xlane.f32.xlu0 %v300_v11 }
 0x13b   : > { %v302_v12 = vpop.xlane.xlu0 %301 }
 0x13c   : > { %v303_v13 = vmul.f32 %v302_v12, %v297_v7 }
 0x13e   : > { %v304_v14 = vadd.f32 1e-05, %v303_v13 }
 0x140   : > { %749 = vrsqrt.f32 %v304_v14  ;;  %vm311_vm2 = vweird.f32 %v304_v14 }
 0x146   : > { %v750_v15 = vpop.eup %749 }
 0x147   : > { %v306_v16 = vmul.f32 %v750_v15, %v304_v14  ;;  %vm312_vm1 = vweird.f32 %v750_v15 }
 0x148   : > { %vm313_vm3 = vmor %vm311_vm2, %vm312_vm1 }
 0x149   : > { %v307_v17 = vmul.f32 %v750_v15, %v306_v16 }
 0x14b   : > { %v308_v18 = vmul.f32 0.5, %v307_v17 }
 0x14d   : > { %v309_v19 = vsub.f32 1.5, %v308_v18 }
 0x14f   : > { %v310_v20 = vmul.f32 %v750_v15, %v309_v19 }
 0x151   : > { %v314_v22 = vsel %vm313_vm3, %v750_v15, %v310_v20 }
 0x152   : > { %v315_v24 = vmul.f32 %v314_v22, %v299_v10 }
 0x154   : > { %v320_v25 = vmul.f32 %v745_v21, %v315_v24 }
 0x156   : > { %v325_v26 = vadd.f32 %v746_v23, %v320_v25 }
 0x158   : > { %v326_v27 = vpack.c.bf16 %v325_v26, %v325_v26 }
 0x15a   : > { %327 = vst [vmem:[#allocation2] sm:$0xf] %v326_v27 }
 0x15b PF: > { %v599_v28 = vld [vmem:[%s1225_s23 + $0x38] sm:$0xff]  ;;  %v598_v29 = vld [vmem:[%s1225_s23 + $0x30] sm:$0xff]  ;;  %v597_v30 = vld [vmem:[%s1225_s23 + $0x28] sm:$0xff]  ;;  %s587_s6 = sshll.u32 %s983_s25, 2  ;;  %s1358_s7 = sld [smem:[#allocation26_spill]] }
 0x15c   : > { %393 = vmatpush.bf16.xpose.msra.mxu0 %v599_v28  ;;  %v596_v31 = vld [vmem:[%s1225_s23 + $0x20] sm:$0xff]  ;;  %v595_v32 = vld [vmem:[%s1225_s23 + $0x18] sm:$0xff]  ;;  %v594_v33 = vld [vmem:[%s1225_s23 + $0x10] sm:$0xff]  ;;  %s418_s12 = sadd.s32 %s979_s24, %s587_s6  ;;  %s422_s0 = sshll.u32 %s282_s30, 4  ;;  %s423_s0 = int_to_ptr.vmem [resolvable:$true] %s422_s0 }
 0x15d   : > { %v593_v34 = vld [vmem:[%s1225_s23 + $0x8] sm:$0xff]  ;;  %v592_v35 = vld [vmem:[%s1225_s23] sm:$0xff]  ;;  %s588_s18 = sshll.u32 %s418_s12, 3  ;;  %s408_s14 = scalar_lea.sflag [#allocation5], %s280_s27 }
 0x161   : > { %v328_v36 = vld [vmem:[#allocation2] sm:$0xf]  ;;  %s420_s8 = scalar_lea.hbm %s1358_s7, %s588_s18  ;;  %s861_s17 = scalar_lea.hbm %s1358_s7, 64 }
 0x162   : > { %s424_s5 = sshll.u32 %s420_s8, 4  ;;  %s425_s5 = int_to_ptr.hbm [resolvable:$true] %s424_s5 }
 0x163   : > { %s855_s21 = sshra.s32 %s425_s5, 4  ;;  %s856_s21 = int_to_ptr.hbm [resolvable:$true] %s855_s21 }
 0x164   : > { %394 = vmatpush.bf16.xpose.msra.mxu0 %v598_v29  ;;  %s857_s1 = scalar_lea.hbm %s856_s21, 8  ;;  %p862_p6 = scmp.lt.s32.totalorder %s856_s21, %s1358_s7 }
 0x165   : > { %p858_p0 = scmp.ne.s32.totalorder %s856_s21, %s857_s1  ;;  %p863_p8 = scmp.lt.s32.totalorder %s861_s17, %s857_s1 }
 0x167   : > { %p859_p3 = pnand %p858_p0, %p1181_p7  ;;  %p864_p9 = por %p863_p8, %p862_p6 }
 0x169   : > { %p860_p5 = pneg %p859_p3 }
 0x16b   : > { %p865_p10 = pnand %p864_p9, %p860_p5 }
 0x16c   : > { %395 = vmatpush.bf16.xpose.msra.mxu0 %v597_v30 }
 0x174   : > { %396 = vmatpush.bf16.xpose.msra.mxu0 %v596_v31 }
 0x17c   : > { %397 = vmatpush.bf16.xpose.msra.mxu0 %v595_v32 }
 0x184   : > { %398 = vmatpush.bf16.xpose.msra.mxu0 %v594_v33 }
 0x18c   : > { %399 = vmatpush.bf16.xpose.msra.mxu0 %v593_v34 }
 0x194   : > { %400 = vmatpush.bf16.xpose.msra.mxu0 %v592_v35 }
 0x19b   : > { %401 = vmatmul.bf16.vlgmr.msra.gmra.mxu0 %v328_v36 }
 0x218   : > { %v402_v37 = vpop.f32.mrf.mxu0 }
 0x219   : > { %406 = vst [vmem:[%s282_s30] sm:$0xff] %v402_v37 }
 0x21a   : > { %868 = shalt.err (!%p865_p10)
}
 0x21b   : > { %608 = dma.vmem_to_hbm [thread:$0]  (%p1181_p7), %s423_s0, 128, %s425_s5, %s408_s14  }
 0x220   : > { %v404_v38 = vpop.f32.mrf.mxu0 }
 0x221 PF: > { %p628_p11 = scmp.ge.s32.totalorder %s995_s28, 2  ;;  %s436_s29 = sand.u32 1, %s943_s15  }
 0x222   : > { %s437_s30 = scalar_lea.sflag [#allocation5], %s436_s29 }
 0x223   : > { %p622_p4 = pnand %p628_p11, %p1189_p12 }
 0x225   : > { %p623_p1 = pneg %p622_p4 }
 0x227   : > { %938 = dma.done.wait (%p623_p1), %s437_s30, 128  }
 0x228   : > { %940 = vsyncadd (%p623_p1), %s437_s30, 4294967168  ;;  %s21_s28 = sadd.s32 1, %s995_s28   ;;  %s1361_s13 = sld [smem:[#allocation14_spill]] }
 0x229   : > { %p1275_p2 = scmp.ge.s32.totalorder %s21_s28, 10   ;;  %s1362_s17 = sld [smem:[#allocation22_spill]] }
 0x22a   : > { %s1363_s9 = sld [smem:[#allocation15_spill]]  ;;  %s1370_s15 = smov %s947_s16 }
 0x22b   : > { %s1364_s20 = sld [smem:[#allocation20_spill]]  ;;  %s1372_s18 = smov %s959_s19 }
 0x22c   : > { %s1365_s6 = sld [smem:[#allocation16_spill]]  ;;  %s1374_s21 = smov %s971_s22 }
 0x22d   : > { %s1366_s23 = sld [smem:[#allocation21_spill]]  ;;  %s1376_s24 = smov %s987_s26 }
 0x22e   : > { %s1367_s25 = sld [smem:[#allocation17_spill]]  ;;  %s1371_s16 = smov %s1361_s13 }
 0x22f   : > { %s1368_s12 = sld [smem:[#allocation18_spill]] }
 0x230   : > { %s1369_s27 = sld [smem:[#allocation19_spill]]  ;;  %s1373_s19 = smov %s1363_s9 }
 0x231   :  { %20 = sbr.rel (!%p1275_p2) target bundleno = 15 (0xf), region = 100 }
 0x232   : > { %s1375_s22 = smov %s1365_s6 }
 0x235   : > { %s1377_s26 = smov %s1368_s12 }
 0x236   :  { %443 = vsyncpa [#allocation4], 1 }
 0x237   :  { %445 = vsyncpa [#allocation4 + $0x1], 1 }
 0x238   :  { %446 = vsyncpa [#allocation7], 1 }
 0x239   :  { %447 = vsyncpa [#allocation5], 1 }
 0x23a   :  { %449 = vsyncpa [#allocation5 + $0x1], 1 }

</bundles_post_ra>
